<compile_context>
chip_gen: v7x
topology: tpu7x:2x2x1
jax: 0.10.0
libtpu: 0.0.40
codegen_flags: <defaults>
</compile_context>

<pallas_src>
import math

import jax
import jax.numpy as jnp
from jax.experimental import pallas as pl
from jax.experimental.pallas import tpu as pltpu


def _cdiv(a, b):
    return -(-a // b)


def _round_up(n, m):
    return _cdiv(n, m) * m


# -----------------------------------------------------------------------------
# Kernel: one grid step processes a tile of `tbp` packed batch rows.  All four
# weight matrices / biases stay VMEM-resident (constant index_map).
# -----------------------------------------------------------------------------
def actor_kernel(x_ref, w1_ref, b1_ref, w2_ref, b2_ref,
                 w2h_ref, b2h_ref, w3_ref, b3_ref, o_ref):
    # f32 rows arrive straight from HBM; cast to bf16 on the VPU (hidden under
    # the DMA) so the MXU runs its native bf16 path with f32 accumulation.
    x = x_ref[...].astype(jnp.bfloat16)
    h = jnp.dot(x, w1_ref[...], preferred_element_type=jnp.float32)
    h = jnp.maximum(h + b1_ref[...], 0.0).astype(jnp.bfloat16)
    h = jnp.dot(h, w2_ref[...], preferred_element_type=jnp.float32)
    h = jnp.maximum(h + b2_ref[...], 0.0).astype(jnp.bfloat16)
    h = jnp.dot(h, w2h_ref[...], preferred_element_type=jnp.float32)
    h = jnp.maximum(h + b2h_ref[...], 0.0).astype(jnp.bfloat16)
    o = jnp.dot(h, w3_ref[...], preferred_element_type=jnp.float32)
    o_ref[...] = (o + b3_ref[...]).astype(o_ref.dtype)


# -----------------------------------------------------------------------------
# Parameter packing (one-time, at init)
# -----------------------------------------------------------------------------
def choose_pack(batch, units, max_pack=16):
    """How many consecutive batch rows to fold into one matrix row.

    Picked so the packed hidden width reaches ~128 lanes (dense vregs for the
    VPU bias/ReLU work, near-unmasked output stores) while bounding the
    block-diagonal MXU flop inflation to ceil(128/units)."""
    target = min(max_pack, max(1, _cdiv(128, max(units, 1))))
    for p in (16, 8, 4, 2, 1):
        if p <= target and batch % p == 0:
            return p
    return 1


def pack_actor_params(params, pack):
    """One-time parameter prep (do at init, not per forward call).

    Each weight W (in, out) becomes the block-diagonal kron(I_pack, W) of
    shape (pack*in, pack*out) in bf16; each bias is tiled to (1, pack*out)
    f32.  With activations reshaped to (batch//pack, pack*in) this computes
    exactly the same per-row MLP, but every matrix dimension is lane-dense."""
    eye = jnp.eye(pack, dtype=jnp.float32)

    def wpack(w):
        return jnp.kron(eye, w.astype(jnp.float32)).astype(jnp.bfloat16)

    def bpack(b):
        return jnp.tile(b.astype(jnp.float32), (1, pack))

    return dict(
        w1=wpack(params["w1"]), b1=bpack(params["b1"]),
        w2=wpack(params["w2"]), b2=bpack(params["b2"]),
        w2h=wpack(params["w2h"]), b2h=bpack(params["b2h"]),
        w3=wpack(params["w3"]), b3=bpack(params["b3"]),
    )


# -----------------------------------------------------------------------------
# Tile sizing
# -----------------------------------------------------------------------------
def _vmem_row_bytes(in_p, units_p, act_p):
    lane = lambda n: _round_up(max(n, 1), 128)
    # double-buffered x & out tiles + ~3 live f32 intermediates per packed row
    return 4 * (2 * lane(in_p) + 2 * lane(act_p) + 3 * lane(units_p))


def _choose_block_rows(bp, block_packed, row_bytes):
    """Packed-row tile: multiple of 16 (bf16 sublane packing) unless the whole
    array is smaller, never larger than the array, >=2 grid steps for large
    batches (so v7x's two TensorCores both get work), and capped so the
    double-buffered working set stays ~<24 MiB of VMEM."""
    if bp <= 16:
        return bp                                   # one full-array block
    g = 16
    tbp = max(g, min(_round_up(block_packed, g), (bp // g) * g))
    if bp >= 4096 and _cdiv(bp, tbp) < 2:           # keep both v7x TCs busy
        tbp = max(g, _round_up(_cdiv(bp, 2), g))
    cap = max(g, ((24 * 1024 * 1024) // row_bytes) // g * g)
    return min(tbp, cap)


# -----------------------------------------------------------------------------
# Forward
# -----------------------------------------------------------------------------
def actor_forward(x, packed_params, *, pack, block_batch=8192):
    """Batched Actor forward on block-diagonal packed parameters.

    x: (batch, state_size) float32 with batch % pack == 0.
    packed_params: output of pack_actor_params(params, pack).
    Returns (batch, action_size) float32 (same semantics as the nn.Module)."""
    batch, state_size = x.shape
    assert batch % pack == 0, (batch, pack)

    in_p = pack * state_size
    units_p = packed_params["w1"].shape[1]
    act_p = packed_params["w3"].shape[1]
    action_size = act_p // pack
    assert packed_params["w1"].shape[0] == in_p

    bp = batch // pack
    # Free, layout-preserving reshape: rows r*pack .. r*pack+pack-1 of x become
    # one lane-dense row of xp (no data movement).
    xp = x.reshape(bp, in_p)

    tbp = _choose_block_rows(bp, max(1, block_batch // pack),
                             _vmem_row_bytes(in_p, units_p, act_p))
    grid = (_cdiv(bp, tbp),)

    w1, b1 = packed_params["w1"], packed_params["b1"]
    w2, b2 = packed_params["w2"], packed_params["b2"]
    w2h, b2h = packed_params["w2h"], packed_params["b2h"]
    w3, b3 = packed_params["w3"], packed_params["b3"]

    in_specs = [
        # Activations stream along the batch grid; the ragged last block (if
        # any) is read-padded / write-masked by Pallas — safe because each
        # output row depends only on its own input row.
        pl.BlockSpec((tbp, in_p), lambda i: (i, 0)),
        # Weights & biases: constant block index -> VMEM-resident, DMA'd once.
        pl.BlockSpec(w1.shape, lambda i: (0, 0)),
        pl.BlockSpec(b1.shape, lambda i: (0, 0)),
        pl.BlockSpec(w2.shape, lambda i: (0, 0)),
        pl.BlockSpec(b2.shape, lambda i: (0, 0)),
        pl.BlockSpec(w2h.shape, lambda i: (0, 0)),
        pl.BlockSpec(b2h.shape, lambda i: (0, 0)),
        pl.BlockSpec(w3.shape, lambda i: (0, 0)),
        pl.BlockSpec(b3.shape, lambda i: (0, 0)),
    ]
    out_specs = pl.BlockSpec((tbp, act_p), lambda i: (i, 0))

    out_p = pl.pallas_call(
        actor_kernel,
        out_shape=jax.ShapeDtypeStruct((bp, act_p), jnp.float32),
        grid=grid,
        in_specs=in_specs,
        out_specs=out_specs,
        compiler_params=pltpu.CompilerParams(
            dimension_semantics=("parallel",),   # batch grid -> v7x's 2 TCs
            vmem_limit_bytes=48 * 1024 * 1024,   # safe under v7x's 64 MiB
        ),
    )(xp, w1, b1, w2, b2, w2h, b2h, w3, b3)

    # Free reshape back to the module's (batch, action_size) layout.
    return out_p.reshape(batch, action_size)


# -----------------------------------------------------------------------------
# Init + references
# -----------------------------------------------------------------------------
def init_linear(key, fan_in, fan_out):
    """Mimics nn.Linear init: U(-1/sqrt(fan_in), 1/sqrt(fan_in)); W stored (in, out)."""
    kw, kb = jax.random.split(key)
    bound = 1.0 / math.sqrt(fan_in)
    w = jax.random.uniform(kw, (fan_in, fan_out), jnp.float32, -bound, bound)
    b = jax.random.uniform(kb, (1, fan_out), jnp.float32, -bound, bound)
    return w, b


def reference_forward_matched(x, params):
    """Same bf16-operand / f32-accumulate path as the kernel (tight check)."""
    xb = x.astype(jnp.bfloat16)
    w1 = params["w1"].astype(jnp.bfloat16)
    w2 = params["w2"].astype(jnp.bfloat16)
    w2h = params["w2h"].astype(jnp.bfloat16)
    w3 = params["w3"].astype(jnp.bfloat16)
    h = jnp.dot(xb, w1, preferred_element_type=jnp.float32) + params["b1"]
    h = jnp.maximum(h, 0.0).astype(jnp.bfloat16)
    h = jnp.dot(h, w2, preferred_element_type=jnp.float32) + params["b2"]
    h = jnp.maximum(h, 0.0).astype(jnp.bfloat16)
    h = jnp.dot(h, w2h, preferred_element_type=jnp.float32) + params["b2h"]
    h = jnp.maximum(h, 0.0).astype(jnp.bfloat16)
    return jnp.dot(h, w3, preferred_element_type=jnp.float32) + params["b3"]


def reference_forward_f32(x, params):
    """Full-f32 reference (loose check against bf16 rounding)."""
    h = jnp.maximum(x @ params["w1"] + params["b1"], 0.0)
    h = jnp.maximum(h @ params["w2"] + params["b2"], 0.0)
    h = jnp.maximum(h @ params["w2h"] + params["b2h"], 0.0)
    return h @ params["w3"] + params["b3"]


if __name__ == "__main__":
    state_size, units, action_size = 16, 32, 8

    key = jax.random.PRNGKey(0)
    k_x1, k_x2, k1, k2, k2h, k3 = jax.random.split(key, 6)

    w1, b1 = init_linear(k1, state_size, units)
    w2, b2 = init_linear(k2, units, units)
    w2h, b2h = init_linear(k2h, units, units)
    w3, b3 = init_linear(k3, units, action_size)
    params = dict(w1=w1, b1=b1, w2=w2, b2=b2, w2h=w2h, b2h=b2h, w3=w3, b3=b3)

    fwd = jax.jit(actor_forward, static_argnames=("pack", "block_batch"))

    def run(x, block_batch):
        batch = x.shape[0]
        pack = choose_pack(batch, units)
        packed = pack_actor_params(params, pack)   # one-time prep
        out = jax.block_until_ready(
            fwd(x, packed, pack=pack, block_batch=block_batch))
        return out, pack

    # Config 1: batch=200 -> pack=4 (hidden width 128); small block_batch so
    # the demo exercises a 4-step grid with a ragged last block.
    x1 = jax.random.normal(k_x1, (200, state_size), jnp.float32)
    out1, pack1 = run(x1, block_batch=64)
    assert pack1 == 4
    assert out1.shape == (200, action_size) and out1.dtype == jnp.float32
    ref1 = reference_forward_matched(x1, params)
    assert jnp.allclose(out1, ref1, atol=1e-3, rtol=1e-3), (
        float(jnp.max(jnp.abs(out1 - ref1))))
    ref1_f32 = reference_forward_f32(x1, params)
    assert jnp.allclose(out1, ref1_f32, atol=2e-1, rtol=2e-1), (
        float(jnp.max(jnp.abs(out1 - ref1_f32))))

    # Config 2: batch=50 (not divisible by 4) -> pack=2 fallback, 2-step ragged grid.
    x2 = jax.random.normal(k_x2, (50, state_size), jnp.float32)
    out2, pack2 = run(x2, block_batch=32)
    assert pack2 == 2
    assert out2.shape == (50, action_size) and out2.dtype == jnp.float32
    ref2 = reference_forward_matched(x2, params)
    assert jnp.allclose(out2, ref2, atol=1e-3, rtol=1e-3), (
        float(jnp.max(jnp.abs(out2 - ref2))))

    print("KERNEL_OK")
</pallas_src>

<mosaic_0001>
module attributes {stable_mosaic.version = 11 : i64} {
  func.func @actor_kernel(%arg0: i32, %arg1: memref<16x64xf32, #tpu.memory_space<vmem>>, %arg2: memref<64x128xbf16, #tpu.memory_space<vmem>>, %arg3: memref<1x128xf32, #tpu.memory_space<vmem>>, %arg4: memref<128x128xbf16, #tpu.memory_space<vmem>>, %arg5: memref<1x128xf32, #tpu.memory_space<vmem>>, %arg6: memref<128x128xbf16, #tpu.memory_space<vmem>>, %arg7: memref<1x128xf32, #tpu.memory_space<vmem>>, %arg8: memref<128x32xbf16, #tpu.memory_space<vmem>>, %arg9: memref<1x32xf32, #tpu.memory_space<vmem>>, %arg10: memref<16x32xf32, #tpu.memory_space<vmem>>) attributes {dimension_semantics = [#tpu.dimension_semantics<parallel>], iteration_bounds = array<i64: 4>, scalar_prefetch = 0 : i64, scratch_operands = 0 : i64, tpu.core_type = #tpu.core_type<tc>, window_params = [{transform_indices = @transform_0, window_bounds = array<i64: 16, 64>}, {pipeline_mode = #tpu.pipeline_mode<synchronous>, transform_indices = @transform_1, window_bounds = array<i64: 64, 128>}, {pipeline_mode = #tpu.pipeline_mode<synchronous>, transform_indices = @transform_2, window_bounds = array<i64: 1, 128>}, {pipeline_mode = #tpu.pipeline_mode<synchronous>, transform_indices = @transform_3, window_bounds = array<i64: 128, 128>}, {pipeline_mode = #tpu.pipeline_mode<synchronous>, transform_indices = @transform_4, window_bounds = array<i64: 1, 128>}, {pipeline_mode = #tpu.pipeline_mode<synchronous>, transform_indices = @transform_5, window_bounds = array<i64: 128, 128>}, {pipeline_mode = #tpu.pipeline_mode<synchronous>, transform_indices = @transform_6, window_bounds = array<i64: 1, 128>}, {pipeline_mode = #tpu.pipeline_mode<synchronous>, transform_indices = @transform_7, window_bounds = array<i64: 128, 32>}, {pipeline_mode = #tpu.pipeline_mode<synchronous>, transform_indices = @transform_8, window_bounds = array<i64: 1, 32>}, {transform_indices = @transform_9, window_bounds = array<i64: 16, 32>}]} {
    %c0 = arith.constant 0 : index
    %c0_0 = arith.constant 0 : index
    %0 = vector.load %arg1[%c0, %c0_0] : memref<16x64xf32, #tpu.memory_space<vmem>>, vector<16x64xf32>
    %1 = arith.truncf %0 : vector<16x64xf32> to vector<16x64xbf16>
    %c0_1 = arith.constant 0 : index
    %c0_2 = arith.constant 0 : index
    %2 = vector.load %arg2[%c0_1, %c0_2] : memref<64x128xbf16, #tpu.memory_space<vmem>>, vector<64x128xbf16>
    %cst = arith.constant dense<0.000000e+00> : vector<16x128xf32>
    %3 = tpu.matmul %1, %2, %cst {dimension_numbers = #tpu.dot_dimension_numbers<[1], [0], [0], [1], [0, 0, 1, 1], [], []>} : vector<16x64xbf16>, vector<64x128xbf16>, vector<16x128xf32> -> vector<16x128xf32>
    %c0_3 = arith.constant 0 : index
    %c0_4 = arith.constant 0 : index
    %4 = vector.load %arg3[%c0_3, %c0_4] : memref<1x128xf32, #tpu.memory_space<vmem>>, vector<1x128xf32>
    %5 = vector.broadcast %4 : vector<1x128xf32> to vector<16x128xf32>
    %6 = arith.addf %3, %5 : vector<16x128xf32>
    %cst_5 = arith.constant 0.000000e+00 : f32
    %7 = vector.broadcast %cst_5 : f32 to vector<16x128xf32>
    %8 = arith.maximumf %6, %7 : vector<16x128xf32>
    %9 = arith.truncf %8 : vector<16x128xf32> to vector<16x128xbf16>
    %c0_6 = arith.constant 0 : index
    %c0_7 = arith.constant 0 : index
    %10 = vector.load %arg4[%c0_6, %c0_7] : memref<128x128xbf16, #tpu.memory_space<vmem>>, vector<128x128xbf16>
    %cst_8 = arith.constant dense<0.000000e+00> : vector<16x128xf32>
    %11 = tpu.matmul %9, %10, %cst_8 {dimension_numbers = #tpu.dot_dimension_numbers<[1], [0], [0], [1], [0, 0, 1, 1], [], []>} : vector<16x128xbf16>, vector<128x128xbf16>, vector<16x128xf32> -> vector<16x128xf32>
    %c0_9 = arith.constant 0 : index
    %c0_10 = arith.constant 0 : index
    %12 = vector.load %arg5[%c0_9, %c0_10] : memref<1x128xf32, #tpu.memory_space<vmem>>, vector<1x128xf32>
    %13 = vector.broadcast %12 : vector<1x128xf32> to vector<16x128xf32>
    %14 = arith.addf %11, %13 : vector<16x128xf32>
    %cst_11 = arith.constant 0.000000e+00 : f32
    %15 = vector.broadcast %cst_11 : f32 to vector<16x128xf32>
    %16 = arith.maximumf %14, %15 : vector<16x128xf32>
    %17 = arith.truncf %16 : vector<16x128xf32> to vector<16x128xbf16>
    %c0_12 = arith.constant 0 : index
    %c0_13 = arith.constant 0 : index
    %18 = vector.load %arg6[%c0_12, %c0_13] : memref<128x128xbf16, #tpu.memory_space<vmem>>, vector<128x128xbf16>
    %cst_14 = arith.constant dense<0.000000e+00> : vector<16x128xf32>
    %19 = tpu.matmul %17, %18, %cst_14 {dimension_numbers = #tpu.dot_dimension_numbers<[1], [0], [0], [1], [0, 0, 1, 1], [], []>} : vector<16x128xbf16>, vector<128x128xbf16>, vector<16x128xf32> -> vector<16x128xf32>
    %c0_15 = arith.constant 0 : index
    %c0_16 = arith.constant 0 : index
    %20 = vector.load %arg7[%c0_15, %c0_16] : memref<1x128xf32, #tpu.memory_space<vmem>>, vector<1x128xf32>
    %21 = vector.broadcast %20 : vector<1x128xf32> to vector<16x128xf32>
    %22 = arith.addf %19, %21 : vector<16x128xf32>
    %cst_17 = arith.constant 0.000000e+00 : f32
    %23 = vector.broadcast %cst_17 : f32 to vector<16x128xf32>
    %24 = arith.maximumf %22, %23 : vector<16x128xf32>
    %25 = arith.truncf %24 : vector<16x128xf32> to vector<16x128xbf16>
    %c0_18 = arith.constant 0 : index
    %c0_19 = arith.constant 0 : index
    %26 = vector.load %arg8[%c0_18, %c0_19] : memref<128x32xbf16, #tpu.memory_space<vmem>>, vector<128x32xbf16>
    %cst_20 = arith.constant dense<0.000000e+00> : vector<16x32xf32>
    %27 = tpu.matmul %25, %26, %cst_20 {dimension_numbers = #tpu.dot_dimension_numbers<[1], [0], [0], [1], [0, 0, 1, 1], [], []>} : vector<16x128xbf16>, vector<128x32xbf16>, vector<16x32xf32> -> vector<16x32xf32>
    %c0_21 = arith.constant 0 : index
    %c0_22 = arith.constant 0 : index
    %28 = vector.load %arg9[%c0_21, %c0_22] : memref<1x32xf32, #tpu.memory_space<vmem>>, vector<1x32xf32>
    %29 = vector.broadcast %28 : vector<1x32xf32> to vector<16x32xf32>
    %30 = arith.addf %27, %29 : vector<16x32xf32>
    %c0_23 = arith.constant 0 : index
    %c0_24 = arith.constant 0 : index
    %31 = vector.load %arg10[%c0_23, %c0_24] : memref<16x32xf32, #tpu.memory_space<vmem>>, vector<16x32xf32>
    tpu.vector_store %arg10[%c0_23, %c0_24], %30 {strides = array<i32>} : memref<16x32xf32, #tpu.memory_space<vmem>>, vector<16x32xf32>,
    return
  }
  func.func @transform_0(%arg0: i32) -> (i32, i32) {
    %c0_i32 = arith.constant 0 : i32
    %c0_i32_0 = arith.constant 0 : i32
    return %arg0, %c0_i32 : i32, i32
  }
  func.func @transform_1(%arg0: i32) -> (i32, i32) {
    %c0_i32 = arith.constant 0 : i32
    %c0_i32_0 = arith.constant 0 : i32
    %c0_i32_1 = arith.constant 0 : i32
    return %c0_i32, %c0_i32_0 : i32, i32
  }
  func.func @transform_2(%arg0: i32) -> (i32, i32) {
    %c0_i32 = arith.constant 0 : i32
    %c0_i32_0 = arith.constant 0 : i32
    %c0_i32_1 = arith.constant 0 : i32
    return %c0_i32, %c0_i32_0 : i32, i32
  }
  func.func @transform_3(%arg0: i32) -> (i32, i32) {
    %c0_i32 = arith.constant 0 : i32
    %c0_i32_0 = arith.constant 0 : i32
    %c0_i32_1 = arith.constant 0 : i32
    return %c0_i32, %c0_i32_0 : i32, i32
  }
  func.func @transform_4(%arg0: i32) -> (i32, i32) {
    %c0_i32 = arith.constant 0 : i32
    %c0_i32_0 = arith.constant 0 : i32
    %c0_i32_1 = arith.constant 0 : i32
    return %c0_i32, %c0_i32_0 : i32, i32
  }
  func.func @transform_5(%arg0: i32) -> (i32, i32) {
    %c0_i32 = arith.constant 0 : i32
    %c0_i32_0 = arith.constant 0 : i32
    %c0_i32_1 = arith.constant 0 : i32
    return %c0_i32, %c0_i32_0 : i32, i32
  }
  func.func @transform_6(%arg0: i32) -> (i32, i32) {
    %c0_i32 = arith.constant 0 : i32
    %c0_i32_0 = arith.constant 0 : i32
    %c0_i32_1 = arith.constant 0 : i32
    return %c0_i32, %c0_i32_0 : i32, i32
  }
  func.func @transform_7(%arg0: i32) -> (i32, i32) {
    %c0_i32 = arith.constant 0 : i32
    %c0_i32_0 = arith.constant 0 : i32
    %c0_i32_1 = arith.constant 0 : i32
    return %c0_i32, %c0_i32_0 : i32, i32
  }
  func.func @transform_8(%arg0: i32) -> (i32, i32) {
    %c0_i32 = arith.constant 0 : i32
    %c0_i32_0 = arith.constant 0 : i32
    %c0_i32_1 = arith.constant 0 : i32
    return %c0_i32, %c0_i32_0 : i32, i32
  }
  func.func @transform_9(%arg0: i32) -> (i32, i32) {
    %c0_i32 = arith.constant 0 : i32
    %c0_i32_0 = arith.constant 0 : i32
    return %arg0, %c0_i32 : i32, i32
  }
}

</mosaic_0001>

<bundles_post_ra>
// kernel: actor_forward.1
= control target key start
LH: loop header
LB: loop body
LE: loop exit
PB: predicated region body
PF: predicated region fallthrough
CT: control target
= control target key end

     0   :  { %s1431_s30 = smov 0   ;;  %s1433_s10 = smov 0   ;;  %s1646_s0 = inlined_call_operand.vmem [shape: f32[50,64], index: 0, kind: input, shape index: {}]   ;;  %s1647_s1 = inlined_call_operand.vmem [shape: bf16[64,128], index: 1, kind: input, shape index: {}]   ;;  %s1648_s2 = inlined_call_operand.vmem [shape: f32[1,128], index: 2, kind: input, shape index: {}]   ;;  %s1649_s3 = inlined_call_operand.vmem [shape: bf16[128,128], index: 3, kind: input, shape index: {}]   ;;  %s1650_s4 = inlined_call_operand.vmem [shape: f32[1,128], index: 4, kind: input, shape index: {}]   ;;  %s1651_s5 = inlined_call_operand.vmem [shape: bf16[128,128], index: 5, kind: input, shape index: {}]   ;;  %s1652_s6 = inlined_call_operand.vmem [shape: f32[1,128], index: 6, kind: input, shape index: {}]   ;;  %s1653_s7 = inlined_call_operand.vmem [shape: bf16[128,32], index: 7, kind: input, shape index: {}]   ;;  %s1654_s8 = inlined_call_operand.vmem [shape: f32[1,32], index: 8, kind: input, shape index: {}]   ;;  %s1655_s9 = inlined_call_operand.vmem [shape: f32[50,32], index: 9, kind: output, shape index: {}]  }
   0x1   :  { %s1435_s11 = smov 0  }
   0x2 LB: > { %s1444_s12 = sadd.s32 4294967295, %s1345_s11   ;;  %s1446_s13 = sadd.s32 1, %s1345_s11   ;;  %s1345_s11 = sphi %s1435_s11, %s1659_s11   ;;  %s1341_s10 = sphi %s1433_s10, %s1658_s10   ;;  %s1337_s30 = sphi %s1431_s30, %s1657_s30  }
   0x3   : > { %s217_s14 = ssub.s32 %s1345_s11, %s1446_s13  ;;  %s220_s15 = sadd.s32 1, %s1341_s10 }
   0x4   : > { %p218_p0 = scmp.eq.s32.totalorder %s217_s14, 0  ;;  %p230_p1 = scmp.ne.s32.totalorder %s1341_s10, %s1337_s30 }
   0x5   : > { %p231_p2 = scmp.eq.s32.totalorder %s1444_s12, 3  ;;  %p1012_p3 = scmp.ge.s32.totalorder %s1345_s11, 1 }
   0x6   : > { %s1454_s16 = scalar_select %p218_p0, %s1341_s10, %s220_s15  }
   0x7   : > { %p1456_p4 = por %p231_p2, %p230_p1  ;;  %p296_p5 = scmp.lt.s32.totalorder %s1345_s11, 5 }
   0x9   : > { %p297_p6 = pnand %p1012_p3, %p296_p5 }
   0xa   : > { %v1263_v0 = vld [vmem:[%s1647_s1] sm:$0xff] (!%p297_p6)   ;;  %v1379_v1 = vmov (!%p297_p6), 0.0   ;;  %v1264_v2 = vld [vmem:[%s1647_s1 + $0x8] sm:$0xff] (!%p297_p6)   ;;  %vm1380_vm0 = vmmov (!%p297_p6), 0   ;;  %s1471_s22 = sshll.u32 (!%p297_p6), %s1444_s12, 1  ;;  %v1265_v4 = vld [vmem:[%s1647_s1 + $0x10] sm:$0xff] (!%p297_p6)  }
   0xb   : > { %300 = sbr.rel (%p297_p6) target bundleno = 953 (0x3b9), region = 56  ;;  %1101 = vmatprep.subr.bf16.mxu0 (!%p297_p6), %v1379_v1  ;;  %1113 = vmatprep.subr.bf16.mxu1 (!%p297_p6), %v1379_v1  ;;  %p340_p7 = scmp.lt.s32.totalorder (!%p297_p6), %s1471_s22, 6  ;;  %v1267_v3 = vld [vmem:[%s1649_s3] sm:$0xff] (!%p297_p6)   ;;  %v1268_v5 = vld [vmem:[%s1649_s3 + $0x8] sm:$0xff] (!%p297_p6)   ;;  %v1266_v6 = vld [vmem:[%s1647_s1 + $0x18] sm:$0xff] (!%p297_p6)   ;;  %vm397_vm1 = vcmask (!%p297_p6), 523264  }
   0xc   : > { %1102 = vmatpush3.bf16.msra.mxu0 (!%p297_p6), %v1263_v0  ;;  %1109 = vmatprep.mubr.msk.bf16.mxu0 (!%p297_p6), %vm1380_vm0, %v1379_v1  ;;  %v1269_v7 = vld [vmem:[%s1649_s3 + $0x10] sm:$0xff] (!%p297_p6)   ;;  %v1270_v10 = vld [vmem:[%s1649_s3 + $0x18] sm:$0xff] (!%p297_p6)   ;;  %v1271_v12 = vld [vmem:[%s1649_s3 + $0x20] sm:$0xff] (!%p297_p6)   ;;  %vm787_vm2 = vcmask (!%p297_p6), 261120  }
   0xd   : > { %1103 = vmatprep.subr.bf16.mxu0 (!%p297_p6), %v1379_v1  ;;  %1129 = vmatprep.mubr.msk.bf16.mxu1 (!%p297_p6), %vm1380_vm0, %v1379_v1  ;;  %v1272_v13 = vld [vmem:[%s1649_s3 + $0x28] sm:$0xff] (!%p297_p6)   ;;  %v1273_v14 = vld [vmem:[%s1649_s3 + $0x30] sm:$0xff] (!%p297_p6)   ;;  %v1274_v15 = vld [vmem:[%s1649_s3 + $0x38] sm:$0xff] (!%p297_p6)  }
   0xe   : > { %1114 = vmatpush3.bf16.msra.mxu1 (!%p297_p6), %v1267_v3  ;;  %v1275_v16 = vld [vmem:[%s1651_s5] sm:$0xff] (!%p297_p6)   ;;  %v1276_v17 = vld [vmem:[%s1651_s5 + $0x8] sm:$0xff] (!%p297_p6)   ;;  %v1277_v18 = vld [vmem:[%s1651_s5 + $0x10] sm:$0xff] (!%p297_p6)  }
   0xf   : > { %1115 = vmatprep.subr.bf16.mxu1 (!%p297_p6), %v1379_v1  ;;  %v1278_v19 = vld [vmem:[%s1651_s5 + $0x18] sm:$0xff] (!%p297_p6)   ;;  %v1279_v20 = vld [vmem:[%s1651_s5 + $0x20] sm:$0xff] (!%p297_p6)   ;;  %v1280_v21 = vld [vmem:[%s1651_s5 + $0x28] sm:$0xff] (!%p297_p6)  }
  0x10   : > { %1104 = vmatpush3.bf16.msra.mxu0 (!%p297_p6), %v1264_v2  ;;  %v1016_v22 = vld [vmem:[%s1648_s2] ss:$0 sm:$0xff] (!%p297_p6)  ;;  %v1281_v32 = vld [vmem:[%s1651_s5 + $0x30] sm:$0xff] (!%p297_p6)   ;;  %v1282_v33 = vld [vmem:[%s1651_s5 + $0x38] sm:$0xff] (!%p297_p6)  }
  0x11   : > { %1105 = vmatprep.subr.bf16.mxu0 (!%p297_p6), %v1379_v1  ;;  %v1283_v34 = vld [vmem:[%s1653_s7] sm:$0xff] (!%p297_p6)   ;;  %v1284_v35 = vld [vmem:[%s1653_s7 + $0x8] sm:$0xff] (!%p297_p6)   ;;  %v1285_v36 = vld [vmem:[%s1653_s7 + $0x10] sm:$0xff] (!%p297_p6)  }
  0x12   : > { %s341_s27 = scalar_select %p340_p7, %s1471_s22, 6  ;;  %1116 = vmatpush3.bf16.msra.mxu1 %v1268_v5  ;;  %v1286_v37 = vld [vmem:[%s1653_s7 + $0x18] sm:$0xff]   ;;  %v1287_v38 = vld [vmem:[%s1653_s7 + $0x20] sm:$0xff]   ;;  %v1288_v39 = vld [vmem:[%s1653_s7 + $0x28] sm:$0xff]  }
  0x13   : > { %1117 = vmatprep.subr.bf16.mxu1 %v1379_v1  ;;  %v1022_v40 = vld [vmem:[%s1650_s4] ss:$0 sm:$0xff]  ;;  %v1289_v50 = vld [vmem:[%s1653_s7 + $0x30] sm:$0xff]   ;;  %v1290_v51 = vld [vmem:[%s1653_s7 + $0x38] sm:$0xff]   ;;  %s1066_s20 = sshll.u32 (%p1456_p4), %s1444_s12, 4 }
  0x14   : > { %s1015_s11 = sshll.u32 %s341_s27, 3  ;;  %1106 = vmatpush3.bf16.msra.mxu0 %v1265_v4  ;;  %v1031_v52 = vld [vmem:[%s1652_s6] ss:$0 sm:$0xff]  ;;  %s1612_s24 = scalar_lea.vmem (%p1456_p4), %s1655_s9, %s1066_s20  }
  0x15   : > { %s343_s18 = scalar_lea.vmem %s1646_s0, %s1015_s11  ;;  %1107 = vmatprep.subr.bf16.mxu0 %v1379_v1  ;;  %s332_s11 = sand.u32 1, %s1337_s30   ;;  %v1040_v62 = vld [vmem:[%s1654_s8] ss:$0 sm:$0xff] }
  0x16   : > { %v355_v8 = vld [vmem:[%s343_s18] sm:$0xff]  ;;  %v356_v9 = vld [vmem:[%s343_s18 + $0x8] sm:$0xff]  ;;  %1118 = vmatpush3.bf16.msra.mxu1 %v1269_v7  ;;  %s1013_s14 = sshll.u32 %s332_s11, 4  ;;  %s798_s30 = ssub.s32 (%p1456_p4), 7, %s1471_s22 }
  0x17   : > { %v357_v11 = vpack.c.bf16 %v356_v9, %v355_v8  ;;  %1119 = vmatprep.subr.bf16.mxu1 %v1379_v1  ;;  %s1601_s19 = scalar_lea.vmem [#allocation2], %s1013_s14   ;;  %p799_p8 = scmp.lt.s32.totalorder (%p1456_p4), %s798_s30, 2 }
  0x18   : > { %1108 = vmatpush3.bf16.msra.mxu0 %v1266_v6 }
  0x19   : > { %1133 = vmatprep.subr.bf16.mxu0 %v1379_v1 }
  0x1a   : > { %1120 = vmatpush3.bf16.msra.mxu1 %v1270_v10 }
  0x1b   : > { %1110 = vmatmul.mubr.msk.bf16.vlgmr.msra.gmra.mrb[0].mxu0 %vm397_vm1, %v357_v11  ;;  %1121 = vmatprep.subr.bf16.mxu1 %v1379_v1 }
  0x1c   : > { %1149 = vmatprep.mubr.msk.bf16.mxu0 %vm1380_vm0, %v1379_v1  ;;  %1134 = vmatpush3.bf16.msra.mxu0 %v1275_v16 }
  0x1d   : > { %1135 = vmatprep.subr.bf16.mxu0 %v1379_v1 }
  0x1e   : > { %1122 = vmatpush3.bf16.msra.mxu1 %v1271_v12 }
  0x1f   : > { %1123 = vmatprep.subr.bf16.mxu1 %v1379_v1 }
  0x20   : > { %1136 = vmatpush3.bf16.msra.mxu0 %v1276_v17 }
  0x21   : > { %1137 = vmatprep.subr.bf16.mxu0 %v1379_v1 }
  0x22   : > { %1124 = vmatpush3.bf16.msra.mxu1 %v1272_v13 }
  0x23   : > { %1125 = vmatprep.subr.bf16.mxu1 %v1379_v1 }
  0x24   : > { %1138 = vmatpush3.bf16.msra.mxu0 %v1277_v18 }
  0x25   : > { %1139 = vmatprep.subr.bf16.mxu0 %v1379_v1 }
  0x26   : > { %1126 = vmatpush3.bf16.msra.mxu1 %v1273_v14 }
  0x27   : > { %1127 = vmatprep.subr.bf16.mxu1 %v1379_v1 }
  0x28   : > { %1140 = vmatpush3.bf16.msra.mxu0 %v1278_v19 }
  0x29   : > { %1141 = vmatprep.subr.bf16.mxu0 %v1379_v1 }
  0x2a   : > { %1128 = vmatpush3.bf16.msra.mxu1 %v1274_v15 }
  0x2b   : > { %1153 = vmatprep.subr.bf16.mxu1 %v1379_v1 }
  0x2c   : > { %1142 = vmatpush3.bf16.msra.mxu0 %v1279_v20 }
  0x2d   : > { %1143 = vmatprep.subr.bf16.mxu0 %v1379_v1 }
  0x30   : > { %1144 = vmatpush3.bf16.msra.mxu0 %v1280_v21 }
  0x31   : > { %1145 = vmatprep.subr.bf16.mxu0 %v1379_v1 }
  0x34   : > { %1146 = vmatpush3.bf16.msra.mxu0 %v1281_v32 }
  0x35   : > { %1147 = vmatprep.subr.bf16.mxu0 %v1379_v1 }
  0x38   : > { %1148 = vmatpush3.bf16.msra.mxu0 %v1282_v33 }
  0xee   : > { %v435_v23 = vpop.f32.mrb[0].mxu0 }
  0xef   : > { %v436_v24 = vadd.f32 %v1016_v22, %v435_v23  ;;  %v1111_v25 = vpop.f32.mrb[1].mxu0 }
  0xf0   : > { %v438_v26 = vpop.f32.mrb[2].mxu0 }
  0xf1   : > { %v439_v27 = vadd.f32 %v1016_v22, %v438_v26  ;;  %v1112_v28 = vpop.f32.mrb[3].mxu0  ;;  %v442_v29 = vmax.f32 %v436_v24, 0.0 }
  0xf3   : > { %v443_v30 = vmax.f32 %v439_v27, 0.0 }
  0xf5   : > { %v444_v31 = vpack.c.bf16 %v443_v30, %v442_v29 }
  0xf7   : > { %1130 = vmatmul.mubr.bf16.vlgmr.msra.gmra.mrb[0].mxu1 %v444_v31 }
  0xf8   : > { %1169 = vmatprep.mubr.msk.bf16.mxu1 %vm1380_vm0, %v1379_v1  ;;  %1154 = vmatpush3.bf16.msra.mxu1 %v1283_v34 }
  0xf9   : > { %1155 = vmatprep.subr.bf16.mxu1 %v1379_v1 }
  0xfc   : > { %1156 = vmatpush3.bf16.msra.mxu1 %v1284_v35 }
  0xfd   : > { %1157 = vmatprep.subr.bf16.mxu1 %v1379_v1 }
 0x100   : > { %1158 = vmatpush3.bf16.msra.mxu1 %v1285_v36 }
 0x101   : > { %1159 = vmatprep.subr.bf16.mxu1 %v1379_v1 }
 0x104   : > { %1160 = vmatpush3.bf16.msra.mxu1 %v1286_v37 }
 0x105   : > { %1161 = vmatprep.subr.bf16.mxu1 %v1379_v1 }
 0x108   : > { %1162 = vmatpush3.bf16.msra.mxu1 %v1287_v38 }
 0x109   : > { %1163 = vmatprep.subr.bf16.mxu1 %v1379_v1 }
 0x10c   : > { %1164 = vmatpush3.bf16.msra.mxu1 %v1288_v39 }
 0x10d   : > { %1165 = vmatprep.subr.bf16.mxu1 %v1379_v1 }
 0x110   : > { %1166 = vmatpush3.bf16.msra.mxu1 %v1289_v50 }
 0x111   : > { %1167 = vmatprep.subr.bf16.mxu1 %v1379_v1 }
 0x114   : > { %1168 = vmatpush3.bf16.msra.mxu1 %v1290_v51 }
 0x1ca   : > { %v550_v41 = vpop.f32.mrb[0].mxu1 }
 0x1cb   : > { %v551_v42 = vadd.f32 %v1022_v40, %v550_v41  ;;  %v1131_v43 = vpop.f32.mrb[1].mxu1 }
 0x1cc   : > { %v553_v44 = vpop.f32.mrb[2].mxu1 }
 0x1cd   : > { %v554_v45 = vadd.f32 %v1022_v40, %v553_v44  ;;  %v1132_v46 = vpop.f32.mrb[3].mxu1  ;;  %v557_v47 = vmax.f32 %v551_v42, 0.0 }
 0x1cf   : > { %v558_v48 = vmax.f32 %v554_v45, 0.0 }
 0x1d1   : > { %v559_v49 = vpack.c.bf16 %v558_v48, %v557_v47 }
 0x1d3   : > { %1150 = vmatmul.mubr.bf16.vlgmr.msra.gmra.mrb[4].mxu0 %v559_v49 }
 0x2a6   : > { %v665_v53 = vpop.f32.mrb[4].mxu0 }
 0x2a7   : > { %v666_v54 = vadd.f32 %v1031_v52, %v665_v53  ;;  %v1151_v55 = vpop.f32.mrb[5].mxu0 }
 0x2a8   : > { %v668_v56 = vpop.f32.mrb[6].mxu0 }
 0x2a9   : > { %v669_v57 = vadd.f32 %v1031_v52, %v668_v56  ;;  %v1152_v58 = vpop.f32.mrb[7].mxu0  ;;  %v672_v59 = vmax.f32 %v666_v54, 0.0 }
 0x2ab   : > { %v673_v60 = vmax.f32 %v669_v57, 0.0 }
 0x2ad   : > { %v674_v61 = vpack.c.bf16 %v673_v60, %v672_v59 }
 0x2af   : > { %1170 = vmatmul.mubr.bf16.vlgmr.msra.gmra.mrb[4].mxu1 %v674_v61 }
 0x381   : > { %796 = sbr.rel (!%p1456_p4) target bundleno = 953 (0x3b9), region = 60 }
 0x382   : > { %v780_v63 = vpop.f32.mrb[4].mxu1 }
 0x383   : > { %v781_v0 = vadd.f32 %v1040_v62, %v780_v63  ;;  %v1171_v1 = vpop.f32.mrb[5].mxu1 }
 0x384   : > { %v783_v2 = vpop.f32.mrb[6].mxu1 }
 0x385   : > { %788 = vst.msk [vmem:[%s1601_s19] sm:$0xff] %vm787_vm2, %v781_v0  ;;  %v784_v3 = vadd.f32 %v1040_v62, %v783_v2  ;;  %v1172_v4 = vpop.f32.mrb[7].mxu1 }
 0x387   : > { %789 = vst.msk [vmem:[%s1601_s19 + $0x8] sm:$0xff] %vm787_vm2, %v784_v3 }
 0x388   : > { %s1661_s30 = smov (!%p799_p8, %s798_s30), 2 }
 0x389   : > { %s1051_s25 = sshll.u32 %s1661_s30, 7 }
 0x38a   : > { %p1054_p9 = scmp.eq.s32.totalorder %s1051_s25, 0 }
 0x38b   : > { %s1618_s26 = sshrl.u32 (!%p1054_p9), %s1661_s30, 1 }
 0x38c   : > { %807 = sbr.rel (%p1054_p9) target bundleno = 953 (0x3b9), region = 64  ;;  %p1055_p10 = scmp.le.s32.totalorder (!%p1054_p9), %s1618_s26, 0 }
 0x393   : > { %965 = sbr.rel (%p1055_p10) target bundleno = 932 (0x3a4), region = 140  ;;  %s1347_s12 = smov (!%p1055_p10), %s1612_s24  }
 0x394   : > { %s1351_s17 = smov (!%p1055_p10), %s1601_s19   ;;  %s1355_s22 = smov (!%p1055_p10), 0  }
 0x395   : > { %s1359_s27 = smov (!%p1055_p10), 0  }
 0x39a LB: >> { %v871_v5 = vld [vmem:[%s1353_s17] sm:$0xff]  ;;  %v873_v6 = vld [vmem:[%s1353_s17 + $0x8] sm:$0xff]  ;;  %s875_s28 = sadd.s32 1, %s1357_s22  ;;  %s865_s27 = sadd.s32 1, %s1361_s27   ;;  %s1361_s27 = sphi %s1359_s27, %s865_s27   ;;  %s1357_s22 = sphi %s1355_s22, %s1356_s22   ;;  %s1353_s17 = sphi %s1351_s17, %s880_s17   ;;  %s1349_s12 = sphi %s1347_s12, %s881_s12  }
 0x39b   : >> { %872 = vst [vmem:[%s1349_s12] sm:$0xff] %v871_v5  ;;  %874 = vst [vmem:[%s1349_s12 + $0x8] sm:$0xff] %v873_v6  ;;  %p876_p11 = scmp.ge.s32.totalorder %s875_s28, %s1618_s26  ;;  %p864_p12 = scmp.ge.s32.totalorder %s865_s27, %s1618_s26 }
 0x39d   : >> { %s1663_s28 = smov (%p876_p11, %s875_s28), 0  ;;  %867 = sbr.rel (!%p864_p12) target bundleno = 922 (0x39a), region = 146 }
 0x39e   : >> { %s1056_s29 = sshll.u32 %s1663_s28, 4  ;;  %s1356_s22 = smov %s1663_s28  }
 0x39f   : >> { %s880_s17 = scalar_lea.vmem %s1601_s19, %s1056_s29 [#allocation2]   ;;  %s881_s12 = scalar_lea.vmem %s1612_s24, %s1056_s29  }
 0x3a4 PF: > { %s1628_s11 = sand.u32 1, %s1661_s30   ;;  %s1067_s14 = sshll.u32 %s1618_s26, 4 }
 0x3a5   : > { %s886_s15 = scalar_lea.vmem %s1601_s19, %s1067_s14 [#allocation2]   ;;  %s888_s18 = scalar_lea.vmem %s1612_s24, %s1067_s14  }
 0x3a6   : > { %p1061_p13 = scmp.le.s32.totalorder %s1628_s11, 0 }
 0x3a7   : > { %s1363_s20 = smov (!%p1061_p13), %s888_s18   ;;  %s1367_s21 = smov (!%p1061_p13), %s886_s15  }
 0x3a8   : > { %979 = sbr.rel (%p1061_p13) target bundleno = 953 (0x3b9), region = 151  ;;  %s1371_s23 = smov (!%p1061_p13), 0  }
 0x3a9   : > { %s1375_s25 = smov (!%p1061_p13), 0  }
 0x3af LB: >> { %v898_v7 = vld [vmem:[%s1369_s21] sm:$0xff]  ;;  %s900_s30 = sadd.s32 1, %s1373_s23  ;;  %s892_s25 = sadd.s32 1, %s1377_s25   ;;  %s1377_s25 = sphi %s1375_s25, %s892_s25   ;;  %s1373_s23 = sphi %s1371_s23, %s1372_s23   ;;  %s1369_s21 = sphi %s1367_s21, %s905_s21   ;;  %s1365_s20 = sphi %s1363_s20, %s906_s20  }
 0x3b0   : >> { %899 = vst [vmem:[%s1365_s20] sm:$0xff] %v898_v7  ;;  %p901_p0 = scmp.ge.s32.totalorder %s900_s30, %s1628_s11  ;;  %p891_p1 = scmp.ge.s32.totalorder %s892_s25, %s1628_s11 }
 0x3b2   : >> { %s1665_s30 = smov (%p901_p0, %s900_s30), 0  ;;  %894 = sbr.rel (!%p891_p1) target bundleno = 943 (0x3af), region = 157 }
 0x3b3   : >> { %s1062_s19 = sshll.u32 %s1665_s30, 3  ;;  %s1372_s23 = smov %s1665_s30  }
 0x3b4   : >> { %s905_s21 = scalar_lea.vmem %s886_s15, %s1062_s19 [#allocation2]   ;;  %s906_s20 = scalar_lea.vmem %s888_s18, %s1062_s19  }
 0x3b9 PF: > { %p16_p2 = scmp.ge.s32.totalorder %s1446_s13, 6   ;;  %s1657_s30 = smov %s1341_s10 }
 0x3ba   : > { %s1658_s10 = smov %s1454_s16  ;;  %s1659_s11 = smov %s1446_s13 }
 0x3bb   :  { %18 = sbr.rel (!%p16_p2) target bundleno = 2 (0x2), region = 168 }

</bundles_post_ra>
